<compile_context>
chip_gen: v5e
topology: v5e:2x2
jax: 0.10.0
libtpu: 0.0.40
codegen_flags: <defaults>
</compile_context>

<pallas_src>
import functools

import jax
import jax.numpy as jnp
from jax.experimental import pallas as pl
from jax.experimental.pallas import tpu as pltpu


def ffn_kernel(x_ref, w1_ref, b1_ref, w2_ref, b2_ref, o_ref):
    # x_ref:  (TM, Hp)  f32 activation tile (pipelined)
    # w1_ref: (Hp, Ip)  bf16 resident   b1_ref: (1, Ip) f32 resident
    # w2_ref: (Ip, Hp)  bf16 resident   b2_ref: (1, Hp) f32 resident
    x = x_ref[...].astype(jnp.bfloat16)

    # fc1: bf16 operands, f32 accumulate on the MXU.
    h = jnp.dot(x, w1_ref[...], preferred_element_type=jnp.float32)
    # Bias + ReLU epilogue in f32 on the VPU.
    h = jnp.maximum(h + b1_ref[...], 0.0)

    # fc2: cast intermediate to bf16 so the MXU stays bf16-fed.
    y = jnp.dot(h.astype(jnp.bfloat16), w2_ref[...],
                preferred_element_type=jnp.float32)
    o_ref[...] = (y + b2_ref[...]).astype(o_ref.dtype)


def _round_up(v, k):
    return ((v + k - 1) // k) * k


def _pad2d(a, rows, cols):
    r, c = a.shape
    if r == rows and c == cols:
        return a
    return jnp.pad(a, ((0, rows - r), (0, cols - c)))


def _vmem_bytes(tm, hp, ip):
    weight = 2 * (hp * ip + ip * hp)                  # bf16, resident
    bias = 4 * (ip + hp)                              # f32, resident
    # double-buffered f32 x tile + double-buffered f32 out tile + f32 h
    act = 4 * (2 * tm * hp + 2 * tm * hp + tm * ip)
    return weight + bias + act


_VMEM_BUDGET = 48 << 20   # headroom under v7x's 64 MiB physical VMEM


def _pick_tm(m, hp, ip, tm_max):
    m8 = _round_up(m, 8)
    for cand in (tm_max, 512, 256, 128, 64, 32, 16, 8):
        tm = min(cand, m8)
        if tm % 8 == 0 and _vmem_bytes(tm, hp, ip) <= _VMEM_BUDGET:
            return tm
    return 8


@functools.partial(jax.jit, static_argnames=("tm_max",))
def feed_forward(x, w1, b1, w2, b2, *, tm_max=512):
    """x: (batch, seq, hidden). w1: (hidden, inter), w2: (inter, hidden)."""
    batch, seq, hidden = x.shape
    inter = w1.shape[1]
    m = batch * seq

    # Lane-dense padding: last dims -> multiples of 128, rows -> multiple of
    # TM (TM is a multiple of 8). Zero padding is exact for this block.
    hp = _round_up(hidden, 128)
    ip = _round_up(inter, 128)
    tm = _pick_tm(m, hp, ip, tm_max)
    mp = _round_up(m, tm)

    x2d = _pad2d(x.reshape(m, hidden), mp, hp)
    w1p = _pad2d(w1, hp, ip).astype(jnp.bfloat16)
    w2p = _pad2d(w2, ip, hp).astype(jnp.bfloat16)
    b1p = _pad2d(b1.reshape(1, inter), 1, ip)
    b2p = _pad2d(b2.reshape(1, hidden), 1, hp)

    grid = (mp // tm,)

    vmem_limit = min(int(1.25 * _vmem_bytes(tm, hp, ip)) + (4 << 20), 56 << 20)

    out2d = pl.pallas_call(
        ffn_kernel,
        out_shape=jax.ShapeDtypeStruct((mp, hp), x.dtype),
        grid_spec=pltpu.PrefetchScalarGridSpec(
            num_scalar_prefetch=0,
            grid=grid,
            in_specs=[
                pl.BlockSpec((tm, hp), lambda i: (i, 0)),   # x tile (pipelined)
                pl.BlockSpec((hp, ip), lambda i: (0, 0)),   # w1 (resident)
                pl.BlockSpec((1, ip), lambda i: (0, 0)),    # b1 (resident)
                pl.BlockSpec((ip, hp), lambda i: (0, 0)),   # w2 (resident)
                pl.BlockSpec((1, hp), lambda i: (0, 0)),    # b2 (resident)
            ],
            out_specs=pl.BlockSpec((tm, hp), lambda i: (i, 0)),
        ),
        compiler_params=pltpu.CompilerParams(
            dimension_semantics=("parallel",),   # megacore-shard M on v7x
            vmem_limit_bytes=vmem_limit,
        ),
        cost_estimate=pl.CostEstimate(
            flops=4 * mp * hp * ip,
            transcendentals=0,
            bytes_accessed=(4 * mp * hp                 # x in (f32)
                            + 2 * (hp * ip + ip * hp)   # bf16 weights
                            + 4 * (ip + hp)             # biases
                            + 4 * mp * hp),             # y out (f32)
        ),
    )(x2d, w1p, b1p, w2p, b2p)

    # TODO(synk): for intermediate sizes too large for resident bf16 weights,
    # add an I-tiling reduction axis with an f32 accumulator in scratch.
    return out2d[:m, :hidden].reshape(batch, seq, hidden)


if __name__ == "__main__":
    # Small BERT-ish shapes.
    batch, seq, hidden, inter = 2, 8, 32, 64

    key = jax.random.PRNGKey(0)
    kx, kw1, kb1, kw2, kb2 = jax.random.split(key, 5)

    x = jax.random.normal(kx, (batch, seq, hidden), dtype=jnp.float32)
    # nn.Linear stores (out, in); we keep the math x @ W^T by building W^T
    # directly as (in, out). Deterministic synthetic init (uniform like PyTorch).
    bound1 = 1.0 / (hidden ** 0.5)
    bound2 = 1.0 / (inter ** 0.5)
    w1 = jax.random.uniform(kw1, (hidden, inter), jnp.float32, -bound1, bound1)
    b1 = jax.random.uniform(kb1, (inter,), jnp.float32, -bound1, bound1)
    w2 = jax.random.uniform(kw2, (inter, hidden), jnp.float32, -bound2, bound2)
    b2 = jax.random.uniform(kb2, (hidden,), jnp.float32, -bound2, bound2)

    out = feed_forward(x, w1, b1, w2, b2)
    out = jax.block_until_ready(out)

    # Pure-JAX f32 reference; kernel uses bf16 MXU operands so tolerance is
    # loosened accordingly.
    ref = jnp.maximum(x @ w1 + b1, 0.0) @ w2 + b2
    assert out.shape == (batch, seq, hidden)
    assert jnp.allclose(out, ref, atol=2e-2, rtol=2e-2), (
        float(jnp.max(jnp.abs(out - ref))))

    print("KERNEL_OK")
</pallas_src>

<mosaic_0001>
module attributes {stable_mosaic.version = 11 : i64} {
  func.func @ffn_kernel(%arg0: i32, %arg1: memref<16x128xf32, #tpu.memory_space<vmem>>, %arg2: memref<128x128xbf16, #tpu.memory_space<vmem>>, %arg3: memref<1x128xf32, #tpu.memory_space<vmem>>, %arg4: memref<128x128xbf16, #tpu.memory_space<vmem>>, %arg5: memref<1x128xf32, #tpu.memory_space<vmem>>, %arg6: memref<16x128xf32, #tpu.memory_space<vmem>>) attributes {dimension_semantics = [#tpu.dimension_semantics<parallel>], iteration_bounds = array<i64: 1>, scalar_prefetch = 0 : i64, scratch_operands = 0 : i64, tpu.core_type = #tpu.core_type<tc>, window_params = [{transform_indices = @transform_0, window_bounds = array<i64: 16, 128>}, {pipeline_mode = #tpu.pipeline_mode<synchronous>, transform_indices = @transform_1, window_bounds = array<i64: 128, 128>}, {pipeline_mode = #tpu.pipeline_mode<synchronous>, transform_indices = @transform_2, window_bounds = array<i64: 1, 128>}, {pipeline_mode = #tpu.pipeline_mode<synchronous>, transform_indices = @transform_3, window_bounds = array<i64: 128, 128>}, {pipeline_mode = #tpu.pipeline_mode<synchronous>, transform_indices = @transform_4, window_bounds = array<i64: 1, 128>}, {transform_indices = @transform_5, window_bounds = array<i64: 16, 128>}]} {
    %c0 = arith.constant 0 : index
    %c0_0 = arith.constant 0 : index
    %0 = vector.load %arg1[%c0, %c0_0] : memref<16x128xf32, #tpu.memory_space<vmem>>, vector<16x128xf32>
    %1 = arith.truncf %0 : vector<16x128xf32> to vector<16x128xbf16>
    %c0_1 = arith.constant 0 : index
    %c0_2 = arith.constant 0 : index
    %2 = vector.load %arg2[%c0_1, %c0_2] : memref<128x128xbf16, #tpu.memory_space<vmem>>, vector<128x128xbf16>
    %cst = arith.constant dense<0.000000e+00> : vector<16x128xf32>
    %3 = tpu.matmul %1, %2, %cst {dimension_numbers = #tpu.dot_dimension_numbers<[1], [0], [0], [1], [0, 0, 1, 1], [], []>} : vector<16x128xbf16>, vector<128x128xbf16>, vector<16x128xf32> -> vector<16x128xf32>
    %c0_3 = arith.constant 0 : index
    %c0_4 = arith.constant 0 : index
    %4 = vector.load %arg3[%c0_3, %c0_4] : memref<1x128xf32, #tpu.memory_space<vmem>>, vector<1x128xf32>
    %5 = vector.broadcast %4 : vector<1x128xf32> to vector<16x128xf32>
    %6 = arith.addf %3, %5 : vector<16x128xf32>
    %cst_5 = arith.constant 0.000000e+00 : f32
    %7 = vector.broadcast %cst_5 : f32 to vector<16x128xf32>
    %8 = arith.maximumf %6, %7 : vector<16x128xf32>
    %9 = arith.truncf %8 : vector<16x128xf32> to vector<16x128xbf16>
    %c0_6 = arith.constant 0 : index
    %c0_7 = arith.constant 0 : index
    %10 = vector.load %arg4[%c0_6, %c0_7] : memref<128x128xbf16, #tpu.memory_space<vmem>>, vector<128x128xbf16>
    %cst_8 = arith.constant dense<0.000000e+00> : vector<16x128xf32>
    %11 = tpu.matmul %9, %10, %cst_8 {dimension_numbers = #tpu.dot_dimension_numbers<[1], [0], [0], [1], [0, 0, 1, 1], [], []>} : vector<16x128xbf16>, vector<128x128xbf16>, vector<16x128xf32> -> vector<16x128xf32>
    %c0_9 = arith.constant 0 : index
    %c0_10 = arith.constant 0 : index
    %12 = vector.load %arg5[%c0_9, %c0_10] : memref<1x128xf32, #tpu.memory_space<vmem>>, vector<1x128xf32>
    %13 = vector.broadcast %12 : vector<1x128xf32> to vector<16x128xf32>
    %14 = arith.addf %11, %13 : vector<16x128xf32>
    %c0_11 = arith.constant 0 : index
    %c0_12 = arith.constant 0 : index
    %15 = vector.load %arg6[%c0_11, %c0_12] : memref<16x128xf32, #tpu.memory_space<vmem>>, vector<16x128xf32>
    tpu.vector_store %arg6[%c0_11, %c0_12], %14 {strides = array<i32>} : memref<16x128xf32, #tpu.memory_space<vmem>>, vector<16x128xf32>,
    return
  }
  func.func @transform_0(%arg0: i32) -> (i32, i32) {
    %c0_i32 = arith.constant 0 : i32
    %c0_i32_0 = arith.constant 0 : i32
    return %arg0, %c0_i32 : i32, i32
  }
  func.func @transform_1(%arg0: i32) -> (i32, i32) {
    %c0_i32 = arith.constant 0 : i32
    %c0_i32_0 = arith.constant 0 : i32
    %c0_i32_1 = arith.constant 0 : i32
    return %c0_i32, %c0_i32_0 : i32, i32
  }
  func.func @transform_2(%arg0: i32) -> (i32, i32) {
    %c0_i32 = arith.constant 0 : i32
    %c0_i32_0 = arith.constant 0 : i32
    %c0_i32_1 = arith.constant 0 : i32
    return %c0_i32, %c0_i32_0 : i32, i32
  }
  func.func @transform_3(%arg0: i32) -> (i32, i32) {
    %c0_i32 = arith.constant 0 : i32
    %c0_i32_0 = arith.constant 0 : i32
    %c0_i32_1 = arith.constant 0 : i32
    return %c0_i32, %c0_i32_0 : i32, i32
  }
  func.func @transform_4(%arg0: i32) -> (i32, i32) {
    %c0_i32 = arith.constant 0 : i32
    %c0_i32_0 = arith.constant 0 : i32
    %c0_i32_1 = arith.constant 0 : i32
    return %c0_i32, %c0_i32_0 : i32, i32
  }
  func.func @transform_5(%arg0: i32) -> (i32, i32) {
    %c0_i32 = arith.constant 0 : i32
    %c0_i32_0 = arith.constant 0 : i32
    return %arg0, %c0_i32 : i32, i32
  }
}

</mosaic_0001>

<bundles_post_ra>
// kernel: feed_forward.1
= control target key start
LH: loop header
LB: loop body
LE: loop exit
PB: predicated region body
PF: predicated region fallthrough
CT: control target
= control target key end

     0   :  { %s374_s1 = inlined_call_operand.vmem [shape: bf16[128,128], index: 1, kind: input, shape index: {}]   ;;  %s375_s3 = inlined_call_operand.vmem [shape: bf16[128,128], index: 3, kind: input, shape index: {}]   ;;  %s376_s2 = inlined_call_operand.vmem [shape: f32[1,128], index: 2, kind: input, shape index: {}]   ;;  %s377_s0 = inlined_call_operand.vmem [shape: f32[16,128], index: 0, kind: input, shape index: {}]   ;;  %s378_s4 = inlined_call_operand.vmem [shape: f32[1,128], index: 4, kind: input, shape index: {}]   ;;  %s379_s5 = inlined_call_operand.vmem [shape: f32[16,128], index: 5, kind: output, shape index: {}]  }
   0x1   :  { %v267_v0 = vld [vmem:[%s374_s1 + $0x38] sm:$0xff]  ;;  %v266_v1 = vld [vmem:[%s374_s1 + $0x30] sm:$0xff]  ;;  %v265_v4 = vld [vmem:[%s374_s1 + $0x28] sm:$0xff] }
   0x2   :  { %91 = vmatpush.bf16.msra.mxu0 %v267_v0  ;;  %v275_v2 = vld [vmem:[%s375_s3 + $0x38] sm:$0xff]  ;;  %v274_v3 = vld [vmem:[%s375_s3 + $0x30] sm:$0xff]  ;;  %v273_v5 = vld [vmem:[%s375_s3 + $0x28] sm:$0xff] }
   0x3   :  { %176 = vmatpush.bf16.msra.mxu1 %v275_v2  ;;  %v264_v6 = vld [vmem:[%s374_s1 + $0x20] sm:$0xff]  ;;  %v263_v8 = vld [vmem:[%s374_s1 + $0x18] sm:$0xff]  ;;  %v262_v9 = vld [vmem:[%s374_s1 + $0x10] sm:$0xff] }
   0x4   :  { %v272_v7 = vld [vmem:[%s375_s3 + $0x20] sm:$0xff]  ;;  %v261_v10 = vld [vmem:[%s374_s1 + $0x8] sm:$0xff]  ;;  %v271_v15 = vld [vmem:[%s375_s3 + $0x18] sm:$0xff] }
   0x5   :  { %v260_v11 = vld [vmem:[%s374_s1] sm:$0xff]  ;;  %v21_v13 = vld [vmem:[%s377_s0 + $0x8] sm:$0xff]  ;;  %v270_v16 = vld [vmem:[%s375_s3 + $0x10] sm:$0xff] }
   0x6   :  { %92 = vmatpush.bf16.msra.mxu0 %v266_v1  ;;  %v20_v12 = vld [vmem:[%s377_s0] sm:$0xff]  ;;  %v269_v17 = vld [vmem:[%s375_s3 + $0x8] sm:$0xff] }
   0x7   :  { %177 = vmatpush.bf16.msra.mxu1 %v274_v3  ;;  %v22_v14 = vpack.c.bf16 %v21_v13, %v20_v12  ;;  %v268_v18 = vld [vmem:[%s375_s3] sm:$0xff] }
   0x8   :  { %v276_v20 = vld [vmem:[%s376_s2] ss:$0 sm:$0xff] }
   0x9   :  { %v277_v27 = vld [vmem:[%s378_s4] ss:$0 sm:$0xff] }
   0xa   :  { %93 = vmatpush.bf16.msra.mxu0 %v265_v4 }
   0xb   :  { %178 = vmatpush.bf16.msra.mxu1 %v273_v5 }
   0xe   :  { %94 = vmatpush.bf16.msra.mxu0 %v264_v6 }
   0xf   :  { %179 = vmatpush.bf16.msra.mxu1 %v272_v7 }
  0x12   :  { %95 = vmatpush.bf16.msra.mxu0 %v263_v8 }
  0x13   :  { %180 = vmatpush.bf16.msra.mxu1 %v271_v15 }
  0x16   :  { %96 = vmatpush.bf16.msra.mxu0 %v262_v9 }
  0x17   :  { %181 = vmatpush.bf16.msra.mxu1 %v270_v16 }
  0x1a   :  { %97 = vmatpush.bf16.msra.mxu0 %v261_v10 }
  0x1b   :  { %182 = vmatpush.bf16.msra.mxu1 %v269_v17 }
  0x1e   :  { %98 = vmatpush.bf16.msra.mxu0 %v260_v11 }
  0x1f   :  { %183 = vmatpush.bf16.msra.mxu1 %v268_v18 }
  0x21   :  { %99 = vmatmul.bf16.vlgmr.msra.gmra.mxu0 %v22_v14 }
  0x9e   :  { %v100_v19 = vpop.f32.mrf.mxu0 }
  0x9f   :  { %v101_v21 = vadd.f32 %v276_v20, %v100_v19 }
  0xa1   :  { %v105_v24 = vmax.f32 %v101_v21, 0.0 }
  0xa6   :  { %v102_v22 = vpop.f32.mrf.mxu0 }
  0xa7   :  { %v103_v23 = vadd.f32 %v276_v20, %v102_v22 }
  0xa9   :  { %v106_v25 = vmax.f32 %v103_v23, 0.0 }
  0xab   :  { %v107_v26 = vpack.c.bf16 %v106_v25, %v105_v24 }
  0xad   :  { %184 = vmatmul.bf16.vlgmr.msra.gmra.mxu1 %v107_v26 }
 0x12a   :  { %v185_v28 = vpop.f32.mrf.mxu1 }
 0x12b   :  { %v186_v29 = vadd.f32 %v277_v27, %v185_v28 }
 0x12d   :  { %190 = vst [vmem:[%s379_s5] sm:$0xff] %v186_v29 }
 0x132   :  { %v187_v30 = vpop.f32.mrf.mxu1 }
 0x133   :  { %v188_v31 = vadd.f32 %v277_v27, %v187_v30 }
 0x135   :  { %191 = vst [vmem:[%s379_s5 + $0x8] sm:$0xff] %v188_v31 }

</bundles_post_ra>
